<compile_context>
chip_gen: v7x
topology: tpu7x:2x2x1
jax: 0.10.0
libtpu: 0.0.40
codegen_flags: <defaults>
</compile_context>

<pallas_src>
import jax
import jax.numpy as jnp
from jax.experimental import pallas as pl
from jax.experimental.pallas import tpu as pltpu


# ---------------------------------------------------------------------------
# helpers
# ---------------------------------------------------------------------------
def _round_up(x, m):
    return ((x + m - 1) // m) * m


def _cdiv(a, b):
    return (a + b - 1) // b


def _vmem_capacity_bytes():
    try:
        return int(pltpu.get_tpu_info().vmem_capacity_bytes)
    except Exception:
        return 64 * 1024 * 1024   # conservative fallback (v7x per-TC VMEM)


# ---------------------------------------------------------------------------
# Fused kernel factory
# ---------------------------------------------------------------------------
def _make_fused_kernel(n_hidden, has_output):
    """Kernel refs: x_ref, [w_i, b_i]*n_hidden, (w_out, b_out)?, o_ref."""

    def kernel(x_ref, *refs):
        o_ref = refs[-1]
        h_bf = x_ref[...]                              # bf16 (TB, D_in)
        h_f32 = h_bf.astype(jnp.float32)
        idx = 0
        for _ in range(n_hidden):
            w = refs[idx][...]                         # bf16 (D_in_pad, D_out_pad)
            b = refs[idx + 1][...]                     # f32  (1, D_out_pad)
            idx += 2
            # bf16 MXU matmul, f32 accumulate; f32 epilogue (bias + ReLU).
            y = jnp.dot(h_bf, w, preferred_element_type=jnp.float32)
            h_f32 = jnp.maximum(y + b, 0.0)
            h_bf = h_f32.astype(jnp.bfloat16)          # next layer's matmul input
            # Dropout: identity in eval mode.
        if has_output:
            w_out = refs[idx][...]                     # f32 (1, D_last_pad)
            b_out = refs[idx + 1][...]                 # f32 (1, 1)
            # Width-1 head: f32 VPU multiply + lane (XLU) reduce, then transpose
            # to a lane-dense (1, TB) row for an unmasked store.
            row = jnp.sum(h_f32 * w_out, axis=-1, keepdims=True) + b_out[0, 0]
            o_ref[...] = jnp.transpose(row).reshape(o_ref.shape).astype(o_ref.dtype)
        else:
            o_ref[...] = h_f32.astype(o_ref.dtype)

    return kernel


# ---------------------------------------------------------------------------
# Tiling policy (VMEM-budgeted, generation-aware)
# ---------------------------------------------------------------------------
def _choose_tiling(B, d_in, widths, weight_bytes, vmem_cap):
    # Per-row VMEM estimate: double-buffered bf16 x tile + double-buffered f32
    # out row + compiler-managed activation slabs (f32 + bf16 of widest layer,
    # ~2 live copies as headroom).
    max_w = max([d_in, 128] + list(widths))
    per_row = 2 * d_in * 2 + 2 * 4 + max_w * (4 + 2) * 2
    budget = int(vmem_cap * 0.6) - weight_bytes
    row_cap = max(16, (budget // max(per_row, 1)) // 16 * 16)
    target = int(min(1024, row_cap))

    num_tiles = max(1, _cdiv(B, target))
    # v7x has 2 TensorCores: ensure >=2 (even) grid steps when the batch is big
    # enough to split, so the "parallel" axis shards across both cores.
    if num_tiles == 1 and B >= 32:
        num_tiles = 2
    if num_tiles > 1 and num_tiles % 2 == 1:
        num_tiles += 1
    batch_tile = _round_up(_cdiv(B, num_tiles), 16)    # 16: bf16 sublane packing
    return batch_tile, num_tiles, per_row


# ---------------------------------------------------------------------------
# Single-pallas_call wrapper for the whole MLP
# ---------------------------------------------------------------------------
def fused_mlp(x, kern_hidden, kern_out, out_logical_width=None):
    B, D_in = x.shape
    n_hidden = len(kern_hidden)
    has_output = kern_out is not None

    flat_params = []
    widths = []
    d_last = D_in
    flops = 0
    for (w, b) in kern_hidden:
        flat_params += [w, b]
        widths.append(w.shape[1])
        d_last = w.shape[1]
    if has_output:
        flat_params += list(kern_out)

    weight_bytes = sum(int(p.size) * p.dtype.itemsize for p in flat_params)
    vmem_cap = _vmem_capacity_bytes()
    batch_tile, num_tiles, per_row = _choose_tiling(
        B, D_in, widths, weight_bytes, vmem_cap)
    B_pad = batch_tile * num_tiles

    for (w, _) in kern_hidden:
        flops += 2 * B_pad * w.shape[0] * w.shape[1]
    if has_output:
        flops += 2 * B_pad * d_last

    # bf16 activations in HBM (halves x traffic); zero-pad the batch.
    x = x.astype(jnp.bfloat16)
    if B_pad != B:
        x = jnp.pad(x, ((0, B_pad - B), (0, 0)))
    grid = (num_tiles,)

    if has_output:
        out_shape = jax.ShapeDtypeStruct((num_tiles, 1, batch_tile), jnp.float32)
        out_spec = pl.BlockSpec((1, 1, batch_tile), lambda i: (i, 0, 0))
        out_bytes = B_pad * 4
    else:
        out_shape = jax.ShapeDtypeStruct((B_pad, d_last), jnp.float32)
        out_spec = pl.BlockSpec((batch_tile, d_last), lambda i: (i, 0))
        out_bytes = B_pad * d_last * 4

    vmem_need = weight_bytes + per_row * batch_tile
    vmem_limit = int(min(max(int(vmem_need * 1.4) + (4 << 20), 32 << 20),
                         int(vmem_cap * 0.9)))
    bytes_accessed = int(x.size) * x.dtype.itemsize + weight_bytes + out_bytes

    kernel = _make_fused_kernel(n_hidden, has_output)

    def run(single_buffer_weights):
        def wspec(shape):
            if single_buffer_weights:
                # Constant index_map -> fetched once; single buffer halves the
                # resident weight VMEM footprint.
                return pl.BlockSpec(shape, lambda i: (0, 0),
                                    pipeline_mode=pl.Buffered(1))
            return pl.BlockSpec(shape, lambda i: (0, 0))

        in_specs = [pl.BlockSpec((batch_tile, D_in), lambda i: (i, 0))]
        in_specs += [wspec(p.shape) for p in flat_params]
        return pl.pallas_call(
            kernel,
            out_shape=out_shape,
            grid=grid,
            in_specs=in_specs,
            out_specs=out_spec,
            compiler_params=pltpu.CompilerParams(
                dimension_semantics=("parallel",),
                vmem_limit_bytes=vmem_limit),
            cost_estimate=pl.CostEstimate(
                flops=int(flops), transcendentals=0,
                bytes_accessed=int(bytes_accessed)),
        )(x, *flat_params)

    try:
        out = run(True)
    except Exception:
        # Fallback: drop the single-buffer pipeline hint if this jax build
        # rejects pipeline_mode=pl.Buffered(1).
        out = run(False)

    if has_output:
        return out.reshape(-1)[:B].reshape(B, 1)
    logical = out_logical_width if out_logical_width is not None else d_last
    return out[:B, :logical]


# ---------------------------------------------------------------------------
# Parameter construction (mirrors the PyTorch __init__, eval-mode BN)
# ---------------------------------------------------------------------------
def init_raw_params(key, input_dim, embed_dims, output_layer=True):
    """Raw (unfolded, unpadded, f32) parameters -- used by the pure-JAX reference."""
    hidden = []
    d_in = input_dim
    for embed_dim in embed_dims:
        if embed_dim == 0:
            continue
        key, wkey = jax.random.split(key)
        # torch.nn.init.normal_(weight, mean=0.0, std=0.01); bias zeros.
        w = 0.01 * jax.random.normal(wkey, (d_in, embed_dim), dtype=jnp.float32)
        b = jnp.zeros((embed_dim,), jnp.float32)
        # BatchNorm1d fresh init: gamma=1, beta=0, running_mean=0, running_var=1.
        gamma = jnp.ones((embed_dim,), jnp.float32)
        beta = jnp.zeros((embed_dim,), jnp.float32)
        mean = jnp.zeros((embed_dim,), jnp.float32)
        var = jnp.ones((embed_dim,), jnp.float32)
        hidden.append((w, b, gamma, beta, mean, var))
        d_in = embed_dim
    out = None
    if output_layer:
        key, wkey = jax.random.split(key)
        w_out = 0.01 * jax.random.normal(wkey, (d_in, 1), dtype=jnp.float32)
        b_out = jnp.zeros((1,), jnp.float32)
        out = (w_out, b_out)
    return hidden, out


def fold_and_pad_params(raw_hidden, raw_out, input_dim, eps=1e-5):
    """Fold eval-mode BN into Linear (in f32), pad feature dims to 128 lanes,
    then cast hidden weights to bf16 (biases and the output head stay f32)."""
    kern_hidden = []
    d_in_pad = input_dim          # the input x itself is not feature-padded
    d_in_log = input_dim
    for (w, b, gamma, beta, mean, var) in raw_hidden:
        d_out = w.shape[1]
        scale = gamma / jnp.sqrt(var + eps)               # (d_out,), f32 fold
        w_f = w * scale[None, :]
        b_f = (b - mean) * scale + beta
        d_out_pad = _round_up(d_out, 128)
        W = jnp.zeros((d_in_pad, d_out_pad), jnp.float32)
        W = W.at[:d_in_log, :d_out].set(w_f)
        Bv = jnp.zeros((1, d_out_pad), jnp.float32)
        Bv = Bv.at[0, :d_out].set(b_f)                    # padded cols stay 0 -> ReLU keeps 0
        kern_hidden.append((W.astype(jnp.bfloat16), Bv))
        d_in_pad, d_in_log = d_out_pad, d_out
    kern_out = None
    if raw_out is not None:
        w_out, b_out = raw_out                            # (d_in_log, 1), (1,)
        Wr = jnp.zeros((1, d_in_pad), jnp.float32)
        Wr = Wr.at[0, :d_in_log].set(w_out[:, 0])
        kern_out = (Wr, b_out.reshape(1, 1).astype(jnp.float32))
    return kern_hidden, kern_out


# ---------------------------------------------------------------------------
# Pure-JAX f32 reference (Linear -> BN(eval) -> ReLU -> Dropout(id))* -> Linear
# ---------------------------------------------------------------------------
def mlp_forward_ref(x, raw_hidden, raw_out, eps=1e-5):
    h = x
    for (w, b, gamma, beta, mean, var) in raw_hidden:
        y = h @ w + b[None, :]
        y = (y - mean[None, :]) / jnp.sqrt(var[None, :] + eps) * gamma[None, :] + beta[None, :]
        h = jnp.maximum(y, 0.0)
    if raw_out is not None:
        w_out, b_out = raw_out
        h = h @ w_out + b_out[None, :]
    return h


if __name__ == "__main__":
    key = jax.random.PRNGKey(0)
    batch, input_dim = 8, 32
    embed_dims = (64, 32)
    dropout = 0.2  # identity in eval mode

    key, xkey = jax.random.split(key)
    x = jax.random.normal(xkey, (batch, input_dim), dtype=jnp.float32)

    raw_hidden, raw_out = init_raw_params(key, input_dim, embed_dims,
                                          output_layer=True)
    kern_hidden, kern_out = fold_and_pad_params(raw_hidden, raw_out, input_dim)

    out = fused_mlp(x, kern_hidden, kern_out)
    out = jax.block_until_ready(out)

    ref = mlp_forward_ref(x, raw_hidden, raw_out)
    assert out.shape == (batch, 1), out.shape
    # bf16 matmul inputs -> use a bf16-appropriate tolerance vs the f32 reference.
    assert jnp.allclose(out, ref, atol=1e-3, rtol=2e-2), (
        "mismatch vs reference, max abs diff = %e"
        % float(jnp.max(jnp.abs(out - ref))))

    print("KERNEL_OK")
</pallas_src>

<mosaic_0001>
module attributes {stable_mosaic.version = 11 : i64} {
  func.func @kernel(%arg0: i32, %arg1: memref<16x32xbf16, #tpu.memory_space<vmem>>, %arg2: memref<32x128xbf16, #tpu.memory_space<vmem>>, %arg3: memref<1x128xf32, #tpu.memory_space<vmem>>, %arg4: memref<128x128xbf16, #tpu.memory_space<vmem>>, %arg5: memref<1x128xf32, #tpu.memory_space<vmem>>, %arg6: memref<1x128xf32, #tpu.memory_space<vmem>>, %arg7: memref<1x1xf32, #tpu.memory_space<vmem>>, %arg8: memref<1x1x16xf32, #tpu.memory_space<vmem>>) attributes {dimension_semantics = [#tpu.dimension_semantics<parallel>], iteration_bounds = array<i64: 1>, scalar_prefetch = 0 : i64, scratch_operands = 0 : i64, tpu.core_type = #tpu.core_type<tc>, window_params = [{transform_indices = @transform_0, window_bounds = array<i64: 16, 32>}, {pipeline_mode = #tpu.pipeline_mode<synchronous>, transform_indices = @transform_1, window_bounds = array<i64: 32, 128>}, {pipeline_mode = #tpu.pipeline_mode<synchronous>, transform_indices = @transform_2, window_bounds = array<i64: 1, 128>}, {pipeline_mode = #tpu.pipeline_mode<synchronous>, transform_indices = @transform_3, window_bounds = array<i64: 128, 128>}, {pipeline_mode = #tpu.pipeline_mode<synchronous>, transform_indices = @transform_4, window_bounds = array<i64: 1, 128>}, {pipeline_mode = #tpu.pipeline_mode<synchronous>, transform_indices = @transform_5, window_bounds = array<i64: 1, 128>}, {pipeline_mode = #tpu.pipeline_mode<synchronous>, transform_indices = @transform_6, window_bounds = array<i64: 1, 1>}, {transform_indices = @transform_7, window_bounds = array<i64: 1, 1, 16>}]} {
    %c0 = arith.constant 0 : index
    %c0_0 = arith.constant 0 : index
    %0 = vector.load %arg1[%c0, %c0_0] : memref<16x32xbf16, #tpu.memory_space<vmem>>, vector<16x32xbf16>
    %c0_1 = arith.constant 0 : index
    %c0_2 = arith.constant 0 : index
    %1 = vector.load %arg2[%c0_1, %c0_2] : memref<32x128xbf16, #tpu.memory_space<vmem>>, vector<32x128xbf16>
    %c0_3 = arith.constant 0 : index
    %c0_4 = arith.constant 0 : index
    %2 = vector.load %arg3[%c0_3, %c0_4] : memref<1x128xf32, #tpu.memory_space<vmem>>, vector<1x128xf32>
    %cst = arith.constant dense<0.000000e+00> : vector<16x128xf32>
    %3 = tpu.matmul %0, %1, %cst {dimension_numbers = #tpu.dot_dimension_numbers<[1], [0], [0], [1], [0, 0, 1, 1], [], []>} : vector<16x32xbf16>, vector<32x128xbf16>, vector<16x128xf32> -> vector<16x128xf32>
    %4 = vector.broadcast %2 : vector<1x128xf32> to vector<16x128xf32>
    %5 = arith.addf %3, %4 : vector<16x128xf32>
    %cst_5 = arith.constant 0.000000e+00 : f32
    %6 = vector.broadcast %cst_5 : f32 to vector<16x128xf32>
    %7 = arith.maximumf %5, %6 : vector<16x128xf32>
    %8 = arith.truncf %7 : vector<16x128xf32> to vector<16x128xbf16>
    %c0_6 = arith.constant 0 : index
    %c0_7 = arith.constant 0 : index
    %9 = vector.load %arg4[%c0_6, %c0_7] : memref<128x128xbf16, #tpu.memory_space<vmem>>, vector<128x128xbf16>
    %c0_8 = arith.constant 0 : index
    %c0_9 = arith.constant 0 : index
    %10 = vector.load %arg5[%c0_8, %c0_9] : memref<1x128xf32, #tpu.memory_space<vmem>>, vector<1x128xf32>
    %cst_10 = arith.constant dense<0.000000e+00> : vector<16x128xf32>
    %11 = tpu.matmul %8, %9, %cst_10 {dimension_numbers = #tpu.dot_dimension_numbers<[1], [0], [0], [1], [0, 0, 1, 1], [], []>} : vector<16x128xbf16>, vector<128x128xbf16>, vector<16x128xf32> -> vector<16x128xf32>
    %12 = vector.broadcast %10 : vector<1x128xf32> to vector<16x128xf32>
    %13 = arith.addf %11, %12 : vector<16x128xf32>
    %cst_11 = arith.constant 0.000000e+00 : f32
    %14 = vector.broadcast %cst_11 : f32 to vector<16x128xf32>
    %15 = arith.maximumf %13, %14 : vector<16x128xf32>
    %c0_12 = arith.constant 0 : index
    %c0_13 = arith.constant 0 : index
    %16 = vector.load %arg6[%c0_12, %c0_13] : memref<1x128xf32, #tpu.memory_space<vmem>>, vector<1x128xf32>
    %c0_14 = arith.constant 0 : index
    %c0_15 = arith.constant 0 : index
    %17 = vector.load %arg7[%c0_14, %c0_15] : memref<1x1xf32, #tpu.memory_space<vmem>>, vector<1x1xf32>
    %18 = vector.broadcast %16 : vector<1x128xf32> to vector<16x128xf32>
    %19 = arith.mulf %15, %18 : vector<16x128xf32>
    %cst_16 = arith.constant dense<0.000000e+00> : vector<16xf32>
    %20 = vector.multi_reduction <add>, %19, %cst_16 [1] : vector<16x128xf32> to vector<16xf32>
    %21 = vector.shape_cast %20 : vector<16xf32> to vector<16x1xf32>
    %22 = vector.extract %17[0, 0] : f32 from vector<1x1xf32>
    %23 = vector.broadcast %22 : f32 to vector<16x1xf32>
    %24 = arith.addf %21, %23 : vector<16x1xf32>
    %25 = tpu.transpose %24, [1, 0] : vector<16x1xf32> -> vector<1x16xf32>
    %26 = vector.shape_cast %25 : vector<1x16xf32> to vector<1x1x16xf32>
    %c0_17 = arith.constant 0 : index
    %c0_18 = arith.constant 0 : index
    %c0_19 = arith.constant 0 : index
    %27 = vector.load %arg8[%c0_17, %c0_18, %c0_19] : memref<1x1x16xf32, #tpu.memory_space<vmem>>, vector<1x1x16xf32>
    tpu.vector_store %arg8[%c0_17, %c0_18, %c0_19], %26 {strides = array<i32>} : memref<1x1x16xf32, #tpu.memory_space<vmem>>, vector<1x1x16xf32>,
    return
  }
  func.func @transform_0(%arg0: i32) -> (i32, i32) {
    %c0_i32 = arith.constant 0 : i32
    %c0_i32_0 = arith.constant 0 : i32
    return %arg0, %c0_i32 : i32, i32
  }
  func.func @transform_1(%arg0: i32) -> (i32, i32) {
    %c0_i32 = arith.constant 0 : i32
    %c0_i32_0 = arith.constant 0 : i32
    %c0_i32_1 = arith.constant 0 : i32
    return %c0_i32, %c0_i32_0 : i32, i32
  }
  func.func @transform_2(%arg0: i32) -> (i32, i32) {
    %c0_i32 = arith.constant 0 : i32
    %c0_i32_0 = arith.constant 0 : i32
    %c0_i32_1 = arith.constant 0 : i32
    return %c0_i32, %c0_i32_0 : i32, i32
  }
  func.func @transform_3(%arg0: i32) -> (i32, i32) {
    %c0_i32 = arith.constant 0 : i32
    %c0_i32_0 = arith.constant 0 : i32
    %c0_i32_1 = arith.constant 0 : i32
    return %c0_i32, %c0_i32_0 : i32, i32
  }
  func.func @transform_4(%arg0: i32) -> (i32, i32) {
    %c0_i32 = arith.constant 0 : i32
    %c0_i32_0 = arith.constant 0 : i32
    %c0_i32_1 = arith.constant 0 : i32
    return %c0_i32, %c0_i32_0 : i32, i32
  }
  func.func @transform_5(%arg0: i32) -> (i32, i32) {
    %c0_i32 = arith.constant 0 : i32
    %c0_i32_0 = arith.constant 0 : i32
    %c0_i32_1 = arith.constant 0 : i32
    return %c0_i32, %c0_i32_0 : i32, i32
  }
  func.func @transform_6(%arg0: i32) -> (i32, i32) {
    %c0_i32 = arith.constant 0 : i32
    %c0_i32_0 = arith.constant 0 : i32
    %c0_i32_1 = arith.constant 0 : i32
    return %c0_i32, %c0_i32_0 : i32, i32
  }
  func.func @transform_7(%arg0: i32) -> (i32, i32, i32) {
    %c0_i32 = arith.constant 0 : i32
    %c0_i32_0 = arith.constant 0 : i32
    %c0_i32_1 = arith.constant 0 : i32
    return %arg0, %c0_i32, %c0_i32_0 : i32, i32, i32
  }
}

module attributes {stable_mosaic.version = 11 : i64} {
  func.func @kernel(%arg0: i32, %arg1: memref<16x32xbf16, #tpu.memory_space<vmem>>, %arg2: memref<32x128xbf16, #tpu.memory_space<vmem>>, %arg3: memref<1x128xf32, #tpu.memory_space<vmem>>, %arg4: memref<128x128xbf16, #tpu.memory_space<vmem>>, %arg5: memref<1x128xf32, #tpu.memory_space<vmem>>, %arg6: memref<1x128xf32, #tpu.memory_space<vmem>>, %arg7: memref<1x1xf32, #tpu.memory_space<vmem>>, %arg8: memref<1x1x16xf32, #tpu.memory_space<vmem>>) attributes {dimension_semantics = [#tpu.dimension_semantics<parallel>], iteration_bounds = array<i64: 1>, scalar_prefetch = 0 : i64, scratch_operands = 0 : i64, tpu.core_type = #tpu.core_type<tc>, window_params = [{transform_indices = @transform_0, window_bounds = array<i64: 16, 32>}, {pipeline_mode = #tpu.pipeline_mode<synchronous>, transform_indices = @transform_1, window_bounds = array<i64: 32, 128>}, {pipeline_mode = #tpu.pipeline_mode<synchronous>, transform_indices = @transform_2, window_bounds = array<i64: 1, 128>}, {pipeline_mode = #tpu.pipeline_mode<synchronous>, transform_indices = @transform_3, window_bounds = array<i64: 128, 128>}, {pipeline_mode = #tpu.pipeline_mode<synchronous>, transform_indices = @transform_4, window_bounds = array<i64: 1, 128>}, {pipeline_mode = #tpu.pipeline_mode<synchronous>, transform_indices = @transform_5, window_bounds = array<i64: 1, 128>}, {pipeline_mode = #tpu.pipeline_mode<synchronous>, transform_indices = @transform_6, window_bounds = array<i64: 1, 1>}, {transform_indices = @transform_7, window_bounds = array<i64: 1, 1, 16>}]} {
    %c0 = arith.constant 0 : index
    %c0_0 = arith.constant 0 : index
    %0 = vector.load %arg1[%c0, %c0_0] : memref<16x32xbf16, #tpu.memory_space<vmem>>, vector<16x32xbf16>
    %c0_1 = arith.constant 0 : index
    %c0_2 = arith.constant 0 : index
    %1 = vector.load %arg2[%c0_1, %c0_2] : memref<32x128xbf16, #tpu.memory_space<vmem>>, vector<32x128xbf16>
    %c0_3 = arith.constant 0 : index
    %c0_4 = arith.constant 0 : index
    %2 = vector.load %arg3[%c0_3, %c0_4] : memref<1x128xf32, #tpu.memory_space<vmem>>, vector<1x128xf32>
    %cst = arith.constant dense<0.000000e+00> : vector<16x128xf32>
    %3 = tpu.matmul %0, %1, %cst {dimension_numbers = #tpu.dot_dimension_numbers<[1], [0], [0], [1], [0, 0, 1, 1], [], []>} : vector<16x32xbf16>, vector<32x128xbf16>, vector<16x128xf32> -> vector<16x128xf32>
    %4 = vector.broadcast %2 : vector<1x128xf32> to vector<16x128xf32>
    %5 = arith.addf %3, %4 : vector<16x128xf32>
    %cst_5 = arith.constant 0.000000e+00 : f32
    %6 = vector.broadcast %cst_5 : f32 to vector<16x128xf32>
    %7 = arith.maximumf %5, %6 : vector<16x128xf32>
    %8 = arith.truncf %7 : vector<16x128xf32> to vector<16x128xbf16>
    %c0_6 = arith.constant 0 : index
    %c0_7 = arith.constant 0 : index
    %9 = vector.load %arg4[%c0_6, %c0_7] : memref<128x128xbf16, #tpu.memory_space<vmem>>, vector<128x128xbf16>
    %c0_8 = arith.constant 0 : index
    %c0_9 = arith.constant 0 : index
    %10 = vector.load %arg5[%c0_8, %c0_9] : memref<1x128xf32, #tpu.memory_space<vmem>>, vector<1x128xf32>
    %cst_10 = arith.constant dense<0.000000e+00> : vector<16x128xf32>
    %11 = tpu.matmul %8, %9, %cst_10 {dimension_numbers = #tpu.dot_dimension_numbers<[1], [0], [0], [1], [0, 0, 1, 1], [], []>} : vector<16x128xbf16>, vector<128x128xbf16>, vector<16x128xf32> -> vector<16x128xf32>
    %12 = vector.broadcast %10 : vector<1x128xf32> to vector<16x128xf32>
    %13 = arith.addf %11, %12 : vector<16x128xf32>
    %cst_11 = arith.constant 0.000000e+00 : f32
    %14 = vector.broadcast %cst_11 : f32 to vector<16x128xf32>
    %15 = arith.maximumf %13, %14 : vector<16x128xf32>
    %c0_12 = arith.constant 0 : index
    %c0_13 = arith.constant 0 : index
    %16 = vector.load %arg6[%c0_12, %c0_13] : memref<1x128xf32, #tpu.memory_space<vmem>>, vector<1x128xf32>
    %c0_14 = arith.constant 0 : index
    %c0_15 = arith.constant 0 : index
    %17 = vector.load %arg7[%c0_14, %c0_15] : memref<1x1xf32, #tpu.memory_space<vmem>>, vector<1x1xf32>
    %18 = vector.broadcast %16 : vector<1x128xf32> to vector<16x128xf32>
    %19 = arith.mulf %15, %18 : vector<16x128xf32>
    %cst_16 = arith.constant dense<0.000000e+00> : vector<16xf32>
    %20 = vector.multi_reduction <add>, %19, %cst_16 [1] : vector<16x128xf32> to vector<16xf32>
    %21 = vector.shape_cast %20 : vector<16xf32> to vector<16x1xf32>
    %22 = vector.extract %17[0, 0] : f32 from vector<1x1xf32>
    %23 = vector.broadcast %22 : f32 to vector<16x1xf32>
    %24 = arith.addf %21, %23 : vector<16x1xf32>
    %25 = tpu.transpose %24, [1, 0] : vector<16x1xf32> -> vector<1x16xf32>
    %26 = vector.shape_cast %25 : vector<1x16xf32> to vector<1x1x16xf32>
    %c0_17 = arith.constant 0 : index
    %c0_18 = arith.constant 0 : index
    %c0_19 = arith.constant 0 : index
    %27 = vector.load %arg8[%c0_17, %c0_18, %c0_19] : memref<1x1x16xf32, #tpu.memory_space<vmem>>, vector<1x1x16xf32>
    tpu.vector_store %arg8[%c0_17, %c0_18, %c0_19], %26 {strides = array<i32>} : memref<1x1x16xf32, #tpu.memory_space<vmem>>, vector<1x1x16xf32>,
    return
  }
  func.func @transform_0(%arg0: i32) -> (i32, i32) {
    %c0_i32 = arith.constant 0 : i32
    %c0_i32_0 = arith.constant 0 : i32
    return %arg0, %c0_i32 : i32, i32
  }
  func.func @transform_1(%arg0: i32) -> (i32, i32) {
    %c0_i32 = arith.constant 0 : i32
    %c0_i32_0 = arith.constant 0 : i32
    %c0_i32_1 = arith.constant 0 : i32
    return %c0_i32, %c0_i32_0 : i32, i32
  }
  func.func @transform_2(%arg0: i32) -> (i32, i32) {
    %c0_i32 = arith.constant 0 : i32
    %c0_i32_0 = arith.constant 0 : i32
    %c0_i32_1 = arith.constant 0 : i32
    return %c0_i32, %c0_i32_0 : i32, i32
  }
  func.func @transform_3(%arg0: i32) -> (i32, i32) {
    %c0_i32 = arith.constant 0 : i32
    %c0_i32_0 = arith.constant 0 : i32
    %c0_i32_1 = arith.constant 0 : i32
    return %c0_i32, %c0_i32_0 : i32, i32
  }
  func.func @transform_4(%arg0: i32) -> (i32, i32) {
    %c0_i32 = arith.constant 0 : i32
    %c0_i32_0 = arith.constant 0 : i32
    %c0_i32_1 = arith.constant 0 : i32
    return %c0_i32, %c0_i32_0 : i32, i32
  }
  func.func @transform_5(%arg0: i32) -> (i32, i32) {
    %c0_i32 = arith.constant 0 : i32
    %c0_i32_0 = arith.constant 0 : i32
    %c0_i32_1 = arith.constant 0 : i32
    return %c0_i32, %c0_i32_0 : i32, i32
  }
  func.func @transform_6(%arg0: i32) -> (i32, i32) {
    %c0_i32 = arith.constant 0 : i32
    %c0_i32_0 = arith.constant 0 : i32
    %c0_i32_1 = arith.constant 0 : i32
    return %c0_i32, %c0_i32_0 : i32, i32
  }
  func.func @transform_7(%arg0: i32) -> (i32, i32, i32) {
    %c0_i32 = arith.constant 0 : i32
    %c0_i32_0 = arith.constant 0 : i32
    %c0_i32_1 = arith.constant 0 : i32
    return %arg0, %c0_i32, %c0_i32_0 : i32, i32, i32
  }
}

</mosaic_0001>

<bundles_post_ra>
// kernel: tpu_custom_call.1
= control target key start
LH: loop header
LB: loop body
LE: loop exit
PB: predicated region body
PF: predicated region fallthrough
CT: control target
= control target key end

     0   :  { %s625_s0 = inlined_call_operand.hbm [shape: bf16[16,32], index: 0, kind: input, shape index: {}]   ;;  %s626_s1 = inlined_call_operand.hbm [shape: bf16[32,128], index: 1, kind: input, shape index: {}]   ;;  %s627_s2 = inlined_call_operand.vmem [shape: f32[1,128], index: 2, kind: input, shape index: {}]   ;;  %s628_s3 = inlined_call_operand.hbm [shape: bf16[128,128], index: 3, kind: input, shape index: {}]   ;;  %s629_s4 = inlined_call_operand.vmem [shape: f32[1,128], index: 4, kind: input, shape index: {}]   ;;  %s630_s5 = inlined_call_operand.vmem [shape: f32[1,128], index: 5, kind: input, shape index: {}]   ;;  %s631_s6 = inlined_call_operand.<no memory space> [shape: f32[1,1], index: 6, kind: input, shape index: {}]   ;;  %s632_s7 = inlined_call_operand.hbm [shape: f32[1,1,16], index: 7, kind: output, shape index: {}]  }
   0x1   :  { %v12_v0 = vstv %s631_s6 }
   0x2   :  { %13 = vst [vmem:[#allocation2] sm:$0x1] %v12_v0 }
   0x3   :  { %14 = vsyncpa [#allocation4], 0 }
   0x4   :  { %15 = vsyncpa [#allocation7], 0 }
   0x5   :  { %16 = vsyncpa [#allocation5], 0  ;;  %s501_s26 = smov [#allocation6]   ;;  %s502_s28 = smov [#allocation3]  }
   0x6   :  { %s34_s27 = sshll.u32 %s501_s26, 4  ;;  %s22_s29 = sshll.u32 %s502_s28, 4  ;;  %s35_s27 = int_to_ptr.vmem [resolvable:$true] %s34_s27  ;;  %s552_s29 = int_to_ptr.vmem [resolvable:$true] %s22_s29 }
   0x7   :  { %s407_s9 = scalar_lea.hbm %s626_s1, 256 }
   0x8   :  { %p408_p0 = scmp.ne.s32.totalorder %s626_s1, %s407_s9  ;;  %p411_p1 = scmp.lt.u32.totalorder %s407_s9, %s626_s1 }
   0xa   :  { %p413_p2 = pnand %p411_p1, %p408_p0 }
   0xc   :  { %416 = shalt.err (!%p413_p2)
}
   0xd   :  { %s417_s13 = scalar_lea.vmem %s35_s27, 256  ;;  %p422_p4 = scmp.lt.s32.totalorder %s35_s27, %s35_s27 }
   0xe   :  { %p418_p3 = scmp.ne.s32.totalorder %s35_s27, %s417_s13  ;;  %p423_p5 = scmp.lt.s32.totalorder %s417_s13, %s417_s13 }
  0x10   :  { %p424_p6 = por %p423_p5, %p422_p4 }
  0x12   :  { %p425_p7 = pnand %p424_p6, %p418_p3 }
  0x14   :  { %428 = shalt.err (!%p425_p7)
}
  0x15   :  { %s503_s14 = smov 64   ;;  %s504_s15 = smov 4  }
  0x16   :  { %40 = dma.hbm_to_vmem [thread:$0]  %s626_s1, 256, %s35_s27, [#allocation7], %s503_s14, %s503_s14, %s504_s15  }
  0x17   :  { %s429_s20 = scalar_lea.hbm %s625_s0, 128 }
  0x18   :  { %p430_p8 = scmp.ne.s32.totalorder %s625_s0, %s429_s20  ;;  %p433_p9 = scmp.lt.u32.totalorder %s429_s20, %s625_s0 }
  0x1a   :  { %p435_p10 = pnand %p433_p9, %p430_p8 }
  0x1c   :  { %438 = shalt.err (!%p435_p10)
}
  0x1d   :  { %s439_s25 = scalar_lea.vmem %s552_s29, 128  ;;  %p444_p12 = scmp.lt.s32.totalorder %s552_s29, %s552_s29 }
  0x1e   :  { %p440_p11 = scmp.ne.s32.totalorder %s552_s29, %s439_s25  ;;  %p445_p13 = scmp.lt.s32.totalorder %s439_s25, %s439_s25 }
  0x20   :  { %p446_p0 = por %p445_p13, %p444_p12 }
  0x22   :  { %p447_p1 = pnand %p446_p0, %p440_p11 }
  0x24   :  { %450 = shalt.err (!%p447_p1)
}
  0x25   :  { %28 = dma.hbm_to_vmem [thread:$0]  %s625_s0, 128, %s552_s29, [#allocation4], %s503_s14, %s503_s14, %s504_s15  }
  0x26   :  { %s505_s27 = smov [#allocation8]   ;;  %s451_s9 = scalar_lea.hbm %s628_s3, 1024 }
  0x27   :  { %s48_s28 = sshll.u32 %s505_s27, 4  ;;  %p452_p2 = scmp.ne.s32.totalorder %s628_s3, %s451_s9  ;;  %s49_s28 = int_to_ptr.vmem [resolvable:$true] %s48_s28 }
  0x28   :  { %p455_p3 = scmp.lt.u32.totalorder %s451_s9, %s628_s3 }
  0x2a   :  { %p457_p4 = pnand %p455_p3, %p452_p2 }
  0x2c   :  { %460 = shalt.err (!%p457_p4)
}
  0x2d   :  { %s461_s13 = scalar_lea.vmem %s49_s28, 1024  ;;  %p466_p6 = scmp.lt.s32.totalorder %s49_s28, %s49_s28 }
  0x2e   :  { %p462_p5 = scmp.ne.s32.totalorder %s49_s28, %s461_s13  ;;  %p467_p7 = scmp.lt.s32.totalorder %s461_s13, %s461_s13 }
  0x30   :  { %p468_p8 = por %p467_p7, %p466_p6 }
  0x32   :  { %p469_p9 = pnand %p468_p8, %p462_p5 }
  0x34   :  { %472 = shalt.err (!%p469_p9)
}
  0x35   :  { %54 = dma.hbm_to_vmem [thread:$0]  %s628_s3, 1024, %s49_s28, [#allocation7], %s503_s14, %s503_s14, %s504_s15  }
  0x36   :  { %495 = dma.done.wait [#allocation4], 128  }
  0x37   :  { %496 = vsyncadd [#allocation4], 4294967168 }
  0x38   :  { %497 = dma.done.wait [#allocation7], 1280  }
  0x39   :  { %498 = vsyncadd [#allocation7], 4294966016  ;;  %v506_v1 = vmov 0.0   ;;  %vm507_vm0 = vmmov 0   ;;  %v396_v2 = vld [vmem:[#allocation6] sm:$0xff]   ;;  %v397_v3 = vld [vmem:[#allocation6 + $0x8] sm:$0xff]  }
  0x3a   :  { %358 = vmatprep.subr.bf16.mxu0 %v506_v1  ;;  %362 = vmatprep.mubr.msk.bf16.mxu0 %vm507_vm0, %v506_v1  ;;  %v399_v4 = vld [vmem:[#allocation8] sm:$0xff]   ;;  %v398_v5 = vld [vmem:[#allocation3] sm:$0xff]   ;;  %vm101_vm1 = vcmask 261120   ;;  %v401_v7 = vld [vmem:[#allocation8 + $0x10] sm:$0xff]   ;;  %vm313_vm2 = vcmask 122880  }
  0x3b   :  { %366 = vmatprep.subr.bf16.mxu1 %v506_v1  ;;  %382 = vmatprep.mubr.msk.bf16.mxu1 %vm507_vm0, %v506_v1  ;;  %v400_v6 = vld [vmem:[#allocation8 + $0x8] sm:$0xff]   ;;  %v402_v8 = vld [vmem:[#allocation8 + $0x18] sm:$0xff]   ;;  %v403_v9 = vld [vmem:[#allocation8 + $0x20] sm:$0xff]  }
  0x3c   :  { %359 = vmatpush3.bf16.msra.mxu0 %v396_v2  ;;  %367 = vmatpush3.bf16.msra.mxu1 %v399_v4  ;;  %v404_v10 = vld [vmem:[#allocation8 + $0x28] sm:$0xff]   ;;  %v405_v11 = vld [vmem:[#allocation8 + $0x30] sm:$0xff]   ;;  %v406_v12 = vld [vmem:[#allocation8 + $0x38] sm:$0xff]  }
  0x3d   :  { %360 = vmatprep.subr.bf16.mxu0 %v506_v1  ;;  %368 = vmatprep.subr.bf16.mxu1 %v506_v1  ;;  %v331_v13 = vld [vmem:[%s627_s2] ss:$0 sm:$0xff] }
  0x3e   :  { %v264_v23 = vld [vmem:[#allocation2] sm:$0x1] }
  0x3f   :  { %386 = vpush %v264_v23  ;;  %v336_v24 = vld [vmem:[%s629_s4] ss:$0 sm:$0xff]  ;;  %s508_s4 = smov [#allocation9]  }
  0x40   :  { %361 = vmatpush3.bf16.msra.mxu0 %v397_v3  ;;  %369 = vmatpush3.bf16.msra.mxu1 %v400_v6  ;;  %v345_v29 = vld [vmem:[%s630_s5] ss:$0 sm:$0xff]  ;;  %s321_s19 = sshll.u32 %s508_s4, 4  ;;  %s322_s19 = int_to_ptr.vmem [resolvable:$true] %s321_s19 }
  0x41   :  { %370 = vmatprep.subr.bf16.mxu1 %v506_v1  ;;  %s473_s5 = scalar_lea.vmem %s322_s19, 16  ;;  %s477_s20 = scalar_lea.vmem %s322_s19, 32 }
  0x42   :  { %p474_p10 = scmp.ne.s32.totalorder %s322_s19, %s473_s5  ;;  %p478_p11 = scmp.lt.s32.totalorder %s322_s19, %s322_s19 }
  0x43   :  { %363 = vmatmul.mubr.msk.bf16.vlgmr.msra.gmra.mrb[0].mxu0 %vm101_vm1, %v398_v5  ;;  %p479_p12 = scmp.lt.s32.totalorder %s477_s20, %s473_s5 }
  0x44   :  { %371 = vmatpush3.bf16.msra.mxu1 %v401_v7 }
  0x45   :  { %372 = vmatprep.subr.bf16.mxu1 %v506_v1  ;;  %p480_p13 = por %p479_p12, %p478_p11 }
  0x47   :  { %p481_p0 = pnand %p480_p13, %p474_p10 }
  0x48   :  { %373 = vmatpush3.bf16.msra.mxu1 %v402_v8 }
  0x49   :  { %374 = vmatprep.subr.bf16.mxu1 %v506_v1 }
  0x4c   :  { %375 = vmatpush3.bf16.msra.mxu1 %v403_v9 }
  0x4d   :  { %376 = vmatprep.subr.bf16.mxu1 %v506_v1 }
  0x50   :  { %377 = vmatpush3.bf16.msra.mxu1 %v404_v10 }
  0x51   :  { %378 = vmatprep.subr.bf16.mxu1 %v506_v1 }
  0x54   :  { %379 = vmatpush3.bf16.msra.mxu1 %v405_v11 }
  0x55   :  { %380 = vmatprep.subr.bf16.mxu1 %v506_v1 }
  0x58   :  { %381 = vmatpush3.bf16.msra.mxu1 %v406_v12 }
  0x70   :  { %s387_s18 = spop %386 }
  0x71   :  { %v278_v36 = vstv %s387_s18 }
 0x116   :  { %v139_v14 = vpop.f32.mrb[0].mxu0 }
 0x117   :  { %v140_v15 = vadd.f32 %v331_v13, %v139_v14  ;;  %v364_v16 = vpop.f32.mrb[1].mxu0 }
 0x118   :  { %v142_v17 = vpop.f32.mrb[2].mxu0 }
 0x119   :  { %v143_v18 = vadd.f32 %v331_v13, %v142_v17  ;;  %v365_v19 = vpop.f32.mrb[3].mxu0  ;;  %v146_v20 = vmax.f32 %v140_v15, 0.0 }
 0x11b   :  { %v147_v21 = vmax.f32 %v143_v18, 0.0 }
 0x11d   :  { %v148_v22 = vpack.c.bf16 %v147_v21, %v146_v20 }
 0x11f   :  { %383 = vmatmul.mubr.bf16.vlgmr.msra.gmra.mrb[0].mxu1 %v148_v22 }
 0x1f2   :  { %v254_v25 = vpop.f32.mrb[0].mxu1 }
 0x1f3   :  { %v255_v26 = vadd.f32 %v336_v24, %v254_v25  ;;  %v384_v27 = vpop.f32.mrb[1].mxu1 }
 0x1f4   :  { %v257_v28 = vpop.f32.mrb[2].mxu1 }
 0x1f5   :  { %v261_v30 = vmax.f32 %v255_v26, 0.0  ;;  %v258_v31 = vadd.f32 %v336_v24, %v257_v28  ;;  %v385_v32 = vpop.f32.mrb[3].mxu1 }
 0x1f7   :  { %v262_v33 = vmax.f32 %v258_v31, 0.0  ;;  %v271_v34 = vmul.f32 %v345_v29, %v261_v30 }
 0x1f9   :  { %273 = vadd.xlane.f32.xlu0 %v271_v34  ;;  %v272_v35 = vmul.f32 %v345_v29, %v262_v33 }
 0x1fd   :  { %275 = vadd.xlane.f32.xlu0 %v272_v35 }
 0x286   :  { %v274_v37 = vpop.xlane.xlu0 %273 }
 0x287   :  { %v279_v38 = vadd.f32 %v278_v36, %v274_v37 }
 0x289   :  { %281 = vxpose.xlu1.b32.start [1/2] (short) (narrow) %v279_v38, 8 }
 0x28a   :  { %v276_v39 = vpop.xlane.xlu0 %275 }
 0x28b   :  { %v280_v40 = vadd.f32 %v278_v36, %v276_v39 }
 0x28d   :  { %282 = vxpose.xlu1.b32.end [2/2] (short) (narrow) %v280_v40, 8 }
 0x309   :  { %v297_v41 = vpop.trf.xlu1 }
 0x30a   :  { %314 = vst.msk [vmem:[#allocation9] sm:$0x1] %vm313_vm2, %v297_v41 }
 0x30b   :  { %484 = shalt.err (!%p481_p0)
}
 0x30c   :  { %s485_s23 = scalar_lea.hbm %s632_s7, 16 }
 0x30d   :  { %p486_p1 = scmp.ne.s32.totalorder %s632_s7, %s485_s23  ;;  %p489_p2 = scmp.lt.u32.totalorder %s485_s23, %s632_s7 }
 0x30f   :  { %p491_p3 = pnand %p489_p2, %p486_p1 }
 0x311   :  { %494 = shalt.err (!%p491_p3)
}
 0x312   :  { %324 = dma.vmem_to_hbm [thread:$0]  %s322_s19, 16, %s632_s7, [#allocation5]  }
 0x313   :  { %499 = dma.done.wait [#allocation5], 16  }
 0x314   :  { %500 = vsyncadd [#allocation5], 4294967280 }
 0x315   :  { %328 = vsyncpa [#allocation4], 1 }
 0x316   :  { %329 = vsyncpa [#allocation7], 1 }
 0x317   :  { %330 = vsyncpa [#allocation5], 1 }

// kernel: tpu_custom_call.1
= control target key start
LH: loop header
LB: loop body
LE: loop exit
PB: predicated region body
PF: predicated region fallthrough
CT: control target
= control target key end

     0   :  { %s625_s0 = inlined_call_operand.hbm [shape: bf16[16,32], index: 0, kind: input, shape index: {}]   ;;  %s626_s1 = inlined_call_operand.hbm [shape: bf16[32,128], index: 1, kind: input, shape index: {}]   ;;  %s627_s2 = inlined_call_operand.vmem [shape: f32[1,128], index: 2, kind: input, shape index: {}]   ;;  %s628_s3 = inlined_call_operand.hbm [shape: bf16[128,128], index: 3, kind: input, shape index: {}]   ;;  %s629_s4 = inlined_call_operand.vmem [shape: f32[1,128], index: 4, kind: input, shape index: {}]   ;;  %s630_s5 = inlined_call_operand.vmem [shape: f32[1,128], index: 5, kind: input, shape index: {}]   ;;  %s631_s6 = inlined_call_operand.<no memory space> [shape: f32[1,1], index: 6, kind: input, shape index: {}]   ;;  %s632_s7 = inlined_call_operand.hbm [shape: f32[1,1,16], index: 7, kind: output, shape index: {}]  }
   0x1   :  { %v12_v0 = vstv %s631_s6 }
   0x2   :  { %13 = vst [vmem:[#allocation2] sm:$0x1] %v12_v0 }
   0x3   :  { %14 = vsyncpa [#allocation4], 0 }
   0x4   :  { %15 = vsyncpa [#allocation7], 0 }
   0x5   :  { %16 = vsyncpa [#allocation5], 0  ;;  %s501_s26 = smov [#allocation6]   ;;  %s502_s28 = smov [#allocation3]  }
   0x6   :  { %s34_s27 = sshll.u32 %s501_s26, 4  ;;  %s22_s29 = sshll.u32 %s502_s28, 4  ;;  %s35_s27 = int_to_ptr.vmem [resolvable:$true] %s34_s27  ;;  %s552_s29 = int_to_ptr.vmem [resolvable:$true] %s22_s29 }
   0x7   :  { %s407_s9 = scalar_lea.hbm %s626_s1, 256 }
   0x8   :  { %p408_p0 = scmp.ne.s32.totalorder %s626_s1, %s407_s9  ;;  %p411_p1 = scmp.lt.u32.totalorder %s407_s9, %s626_s1 }
   0xa   :  { %p413_p2 = pnand %p411_p1, %p408_p0 }
   0xc   :  { %416 = shalt.err (!%p413_p2)
}
   0xd   :  { %s417_s13 = scalar_lea.vmem %s35_s27, 256  ;;  %p422_p4 = scmp.lt.s32.totalorder %s35_s27, %s35_s27 }
   0xe   :  { %p418_p3 = scmp.ne.s32.totalorder %s35_s27, %s417_s13  ;;  %p423_p5 = scmp.lt.s32.totalorder %s417_s13, %s417_s13 }
  0x10   :  { %p424_p6 = por %p423_p5, %p422_p4 }
  0x12   :  { %p425_p7 = pnand %p424_p6, %p418_p3 }
  0x14   :  { %428 = shalt.err (!%p425_p7)
}
  0x15   :  { %s503_s14 = smov 64   ;;  %s504_s15 = smov 4  }
  0x16   :  { %40 = dma.hbm_to_vmem [thread:$0]  %s626_s1, 256, %s35_s27, [#allocation7], %s503_s14, %s503_s14, %s504_s15  }
  0x17   :  { %s429_s20 = scalar_lea.hbm %s625_s0, 128 }
  0x18   :  { %p430_p8 = scmp.ne.s32.totalorder %s625_s0, %s429_s20  ;;  %p433_p9 = scmp.lt.u32.totalorder %s429_s20, %s625_s0 }
  0x1a   :  { %p435_p10 = pnand %p433_p9, %p430_p8 }
  0x1c   :  { %438 = shalt.err (!%p435_p10)
}
  0x1d   :  { %s439_s25 = scalar_lea.vmem %s552_s29, 128  ;;  %p444_p12 = scmp.lt.s32.totalorder %s552_s29, %s552_s29 }
  0x1e   :  { %p440_p11 = scmp.ne.s32.totalorder %s552_s29, %s439_s25  ;;  %p445_p13 = scmp.lt.s32.totalorder %s439_s25, %s439_s25 }
  0x20   :  { %p446_p0 = por %p445_p13, %p444_p12 }
  0x22   :  { %p447_p1 = pnand %p446_p0, %p440_p11 }
  0x24   :  { %450 = shalt.err (!%p447_p1)
}
  0x25   :  { %28 = dma.hbm_to_vmem [thread:$0]  %s625_s0, 128, %s552_s29, [#allocation4], %s503_s14, %s503_s14, %s504_s15  }
  0x26   :  { %s505_s27 = smov [#allocation8]   ;;  %s451_s9 = scalar_lea.hbm %s628_s3, 1024 }
  0x27   :  { %s48_s28 = sshll.u32 %s505_s27, 4  ;;  %p452_p2 = scmp.ne.s32.totalorder %s628_s3, %s451_s9  ;;  %s49_s28 = int_to_ptr.vmem [resolvable:$true] %s48_s28 }
  0x28   :  { %p455_p3 = scmp.lt.u32.totalorder %s451_s9, %s628_s3 }
  0x2a   :  { %p457_p4 = pnand %p455_p3, %p452_p2 }
  0x2c   :  { %460 = shalt.err (!%p457_p4)
}
  0x2d   :  { %s461_s13 = scalar_lea.vmem %s49_s28, 1024  ;;  %p466_p6 = scmp.lt.s32.totalorder %s49_s28, %s49_s28 }
  0x2e   :  { %p462_p5 = scmp.ne.s32.totalorder %s49_s28, %s461_s13  ;;  %p467_p7 = scmp.lt.s32.totalorder %s461_s13, %s461_s13 }
  0x30   :  { %p468_p8 = por %p467_p7, %p466_p6 }
  0x32   :  { %p469_p9 = pnand %p468_p8, %p462_p5 }
  0x34   :  { %472 = shalt.err (!%p469_p9)
}
  0x35   :  { %54 = dma.hbm_to_vmem [thread:$0]  %s628_s3, 1024, %s49_s28, [#allocation7], %s503_s14, %s503_s14, %s504_s15  }
  0x36   :  { %495 = dma.done.wait [#allocation4], 128  }
  0x37   :  { %496 = vsyncadd [#allocation4], 4294967168 }
  0x38   :  { %497 = dma.done.wait [#allocation7], 1280  }
  0x39   :  { %498 = vsyncadd [#allocation7], 4294966016  ;;  %v506_v1 = vmov 0.0   ;;  %vm507_vm0 = vmmov 0   ;;  %v396_v2 = vld [vmem:[#allocation6] sm:$0xff]   ;;  %v397_v3 = vld [vmem:[#allocation6 + $0x8] sm:$0xff]  }
  0x3a   :  { %358 = vmatprep.subr.bf16.mxu0 %v506_v1  ;;  %362 = vmatprep.mubr.msk.bf16.mxu0 %vm507_vm0, %v506_v1  ;;  %v399_v4 = vld [vmem:[#allocation8] sm:$0xff]   ;;  %v398_v5 = vld [vmem:[#allocation3] sm:$0xff]   ;;  %vm101_vm1 = vcmask 261120   ;;  %v401_v7 = vld [vmem:[#allocation8 + $0x10] sm:$0xff]   ;;  %vm313_vm2 = vcmask 122880  }
  0x3b   :  { %366 = vmatprep.subr.bf16.mxu1 %v506_v1  ;;  %382 = vmatprep.mubr.msk.bf16.mxu1 %vm507_vm0, %v506_v1  ;;  %v400_v6 = vld [vmem:[#allocation8 + $0x8] sm:$0xff]   ;;  %v402_v8 = vld [vmem:[#allocation8 + $0x18] sm:$0xff]   ;;  %v403_v9 = vld [vmem:[#allocation8 + $0x20] sm:$0xff]  }
  0x3c   :  { %359 = vmatpush3.bf16.msra.mxu0 %v396_v2  ;;  %367 = vmatpush3.bf16.msra.mxu1 %v399_v4  ;;  %v404_v10 = vld [vmem:[#allocation8 + $0x28] sm:$0xff]   ;;  %v405_v11 = vld [vmem:[#allocation8 + $0x30] sm:$0xff]   ;;  %v406_v12 = vld [vmem:[#allocation8 + $0x38] sm:$0xff]  }
  0x3d   :  { %360 = vmatprep.subr.bf16.mxu0 %v506_v1  ;;  %368 = vmatprep.subr.bf16.mxu1 %v506_v1  ;;  %v331_v13 = vld [vmem:[%s627_s2] ss:$0 sm:$0xff] }
  0x3e   :  { %v264_v23 = vld [vmem:[#allocation2] sm:$0x1] }
  0x3f   :  { %386 = vpush %v264_v23  ;;  %v336_v24 = vld [vmem:[%s629_s4] ss:$0 sm:$0xff]  ;;  %s508_s4 = smov [#allocation9]  }
  0x40   :  { %361 = vmatpush3.bf16.msra.mxu0 %v397_v3  ;;  %369 = vmatpush3.bf16.msra.mxu1 %v400_v6  ;;  %v345_v29 = vld [vmem:[%s630_s5] ss:$0 sm:$0xff]  ;;  %s321_s19 = sshll.u32 %s508_s4, 4  ;;  %s322_s19 = int_to_ptr.vmem [resolvable:$true] %s321_s19 }
  0x41   :  { %370 = vmatprep.subr.bf16.mxu1 %v506_v1  ;;  %s473_s5 = scalar_lea.vmem %s322_s19, 16  ;;  %s477_s20 = scalar_lea.vmem %s322_s19, 32 }
  0x42   :  { %p474_p10 = scmp.ne.s32.totalorder %s322_s19, %s473_s5  ;;  %p478_p11 = scmp.lt.s32.totalorder %s322_s19, %s322_s19 }
  0x43   :  { %363 = vmatmul.mubr.msk.bf16.vlgmr.msra.gmra.mrb[0].mxu0 %vm101_vm1, %v398_v5  ;;  %p479_p12 = scmp.lt.s32.totalorder %s477_s20, %s473_s5 }
  0x44   :  { %371 = vmatpush3.bf16.msra.mxu1 %v401_v7 }
  0x45   :  { %372 = vmatprep.subr.bf16.mxu1 %v506_v1  ;;  %p480_p13 = por %p479_p12, %p478_p11 }
  0x47   :  { %p481_p0 = pnand %p480_p13, %p474_p10 }
  0x48   :  { %373 = vmatpush3.bf16.msra.mxu1 %v402_v8 }
  0x49   :  { %374 = vmatprep.subr.bf16.mxu1 %v506_v1 }
  0x4c   :  { %375 = vmatpush3.bf16.msra.mxu1 %v403_v9 }
  0x4d   :  { %376 = vmatprep.subr.bf16.mxu1 %v506_v1 }
  0x50   :  { %377 = vmatpush3.bf16.msra.mxu1 %v404_v10 }
  0x51   :  { %378 = vmatprep.subr.bf16.mxu1 %v506_v1 }
  0x54   :  { %379 = vmatpush3.bf16.msra.mxu1 %v405_v11 }
  0x55   :  { %380 = vmatprep.subr.bf16.mxu1 %v506_v1 }
  0x58   :  { %381 = vmatpush3.bf16.msra.mxu1 %v406_v12 }
  0x70   :  { %s387_s18 = spop %386 }
  0x71   :  { %v278_v36 = vstv %s387_s18 }
 0x116   :  { %v139_v14 = vpop.f32.mrb[0].mxu0 }
 0x117   :  { %v140_v15 = vadd.f32 %v331_v13, %v139_v14  ;;  %v364_v16 = vpop.f32.mrb[1].mxu0 }
 0x118   :  { %v142_v17 = vpop.f32.mrb[2].mxu0 }
 0x119   :  { %v143_v18 = vadd.f32 %v331_v13, %v142_v17  ;;  %v365_v19 = vpop.f32.mrb[3].mxu0  ;;  %v146_v20 = vmax.f32 %v140_v15, 0.0 }
 0x11b   :  { %v147_v21 = vmax.f32 %v143_v18, 0.0 }
 0x11d   :  { %v148_v22 = vpack.c.bf16 %v147_v21, %v146_v20 }
 0x11f   :  { %383 = vmatmul.mubr.bf16.vlgmr.msra.gmra.mrb[0].mxu1 %v148_v22 }
 0x1f2   :  { %v254_v25 = vpop.f32.mrb[0].mxu1 }
 0x1f3   :  { %v255_v26 = vadd.f32 %v336_v24, %v254_v25  ;;  %v384_v27 = vpop.f32.mrb[1].mxu1 }
 0x1f4   :  { %v257_v28 = vpop.f32.mrb[2].mxu1 }
 0x1f5   :  { %v261_v30 = vmax.f32 %v255_v26, 0.0  ;;  %v258_v31 = vadd.f32 %v336_v24, %v257_v28  ;;  %v385_v32 = vpop.f32.mrb[3].mxu1 }
 0x1f7   :  { %v262_v33 = vmax.f32 %v258_v31, 0.0  ;;  %v271_v34 = vmul.f32 %v345_v29, %v261_v30 }
 0x1f9   :  { %273 = vadd.xlane.f32.xlu0 %v271_v34  ;;  %v272_v35 = vmul.f32 %v345_v29, %v262_v33 }
 0x1fd   :  { %275 = vadd.xlane.f32.xlu0 %v272_v35 }
 0x286   :  { %v274_v37 = vpop.xlane.xlu0 %273 }
 0x287   :  { %v279_v38 = vadd.f32 %v278_v36, %v274_v37 }
 0x289   :  { %281 = vxpose.xlu1.b32.start [1/2] (short) (narrow) %v279_v38, 8 }
 0x28a   :  { %v276_v39 = vpop.xlane.xlu0 %275 }
 0x28b   :  { %v280_v40 = vadd.f32 %v278_v36, %v276_v39 }
 0x28d   :  { %282 = vxpose.xlu1.b32.end [2/2] (short) (narrow) %v280_v40, 8 }
 0x309   :  { %v297_v41 = vpop.trf.xlu1 }
 0x30a   :  { %314 = vst.msk [vmem:[#allocation9] sm:$0x1] %vm313_vm2, %v297_v41 }
 0x30b   :  { %484 = shalt.err (!%p481_p0)
}
 0x30c   :  { %s485_s23 = scalar_lea.hbm %s632_s7, 16 }
 0x30d   :  { %p486_p1 = scmp.ne.s32.totalorder %s632_s7, %s485_s23  ;;  %p489_p2 = scmp.lt.u32.totalorder %s485_s23, %s632_s7 }
 0x30f   :  { %p491_p3 = pnand %p489_p2, %p486_p1 }
 0x311   :  { %494 = shalt.err (!%p491_p3)
}
 0x312   :  { %324 = dma.vmem_to_hbm [thread:$0]  %s322_s19, 16, %s632_s7, [#allocation5]  }
 0x313   :  { %499 = dma.done.wait [#allocation5], 16  }
 0x314   :  { %500 = vsyncadd [#allocation5], 4294967280 }
 0x315   :  { %328 = vsyncpa [#allocation4], 1 }
 0x316   :  { %329 = vsyncpa [#allocation7], 1 }
 0x317   :  { %330 = vsyncpa [#allocation5], 1 }

</bundles_post_ra>
